<compile_context>
chip_gen: v5e
topology: v5e:2x2
jax: 0.10.0
libtpu: 0.0.40
codegen_flags: <defaults>
</compile_context>

<pallas_src>
import math
import jax
import jax.numpy as jnp
from jax.experimental import pallas as pl
from jax.experimental.pallas import tpu as pltpu

# ----- small, module-consistent sizes -----
B = 2          # batch
S = 8          # sequence length
D = 32         # embedding_dim
H = 4          # num_heads
HEAD_DIM = D // H
MLP = 64       # mlp_size
EPS = 1e-5     # nn.LayerNorm default eps


def _layernorm(x, w, b):
    mu = jnp.mean(x, axis=-1, keepdims=True)
    var = jnp.mean((x - mu) ** 2, axis=-1, keepdims=True)
    return (x - mu) * jax.lax.rsqrt(var + EPS) * w + b


def encoder_block_kernel(x_ref,
                         ln1w_ref, ln1b_ref,
                         wqkv_ref, bqkv_ref,
                         wo_ref, bo_ref,
                         ln2w_ref, ln2b_ref,
                         w1_ref, b1_ref,
                         w2_ref, b2_ref,
                         o_ref):
    x = x_ref[...]                                   # (B*S, D) = (16, 32)

    # ---------------- attention residual sub-block ----------------
    xn = _layernorm(x, ln1w_ref[0], ln1b_ref[0])

    # fused QKV projection (single MXU matmul); Q columns pre-scaled by 1/sqrt(head_dim)
    qkv = jnp.dot(xn, wqkv_ref[...], preferred_element_type=jnp.float32) + bqkv_ref[0]  # (16, 3D)

    qkv3 = qkv.reshape(B, S, 3 * D)                  # free split at sublane-tile boundary
    q = qkv3[:, :, 0:D]
    k = qkv3[:, :, D:2 * D]
    v = qkv3[:, :, 2 * D:3 * D]

    # head-batched layout: merge (head, batch) into one leading batch axis g = h*B + b
    qh = jnp.concatenate([q[:, :, h * HEAD_DIM:(h + 1) * HEAD_DIM] for h in range(H)], axis=0)
    kh = jnp.concatenate([k[:, :, h * HEAD_DIM:(h + 1) * HEAD_DIM] for h in range(H)], axis=0)
    vh = jnp.concatenate([v[:, :, h * HEAD_DIM:(h + 1) * HEAD_DIM] for h in range(H)], axis=0)
    # qh/kh/vh: (H*B, S, HEAD_DIM) = (8, 8, 8)

    s = jnp.einsum('gqd,gkd->gqk', qh, kh, preferred_element_type=jnp.float32)  # (H*B, S, S)
    s = s - jnp.max(s, axis=-1, keepdims=True)
    p = jnp.exp(s)
    p = p * pl.reciprocal(jnp.sum(p, axis=-1, keepdims=True), approx=True)      # EUP divide
    ctx = jnp.einsum('gqk,gkd->gqd', p, vh, preferred_element_type=jnp.float32)  # (H*B, S, hd)

    # reassemble heads along the feature (lane) axis -> (B, S, D) -> (B*S, D)
    attn = jnp.concatenate([ctx[h * B:(h + 1) * B] for h in range(H)], axis=-1)  # (B, S, D)
    attn = attn.reshape(B * S, D)

    y = jnp.dot(attn, wo_ref[...], preferred_element_type=jnp.float32) + bo_ref[0] + x  # residual

    # ---------------- MLP residual sub-block ----------------
    yn = _layernorm(y, ln2w_ref[0], ln2b_ref[0])
    h1 = jnp.dot(yn, w1_ref[...], preferred_element_type=jnp.float32) + b1_ref[0]       # (16, MLP)
    # exact GELU (PyTorch nn.GELU default)
    g = 0.5 * h1 * (1.0 + jax.lax.erf(h1 * (1.0 / math.sqrt(2.0))))
    z = jnp.dot(g, w2_ref[...], preferred_element_type=jnp.float32) + b2_ref[0] + y     # residual

    o_ref[...] = z


def transformer_encoder_block(x, params):
    b, s, d = x.shape
    # fold the attention scale into the Q projection (wrapper-side, one-time)
    scale = 1.0 / math.sqrt(HEAD_DIM)
    w_qkv = params["w_qkv"].at[:, :D].multiply(scale)
    b_qkv = params["b_qkv"].at[:, :D].multiply(scale)

    x2d = x.reshape(b * s, d)                        # lane-friendly 2-D activation tile
    vmem_spec = pl.BlockSpec(memory_space=pltpu.MemorySpace.VMEM)

    out2d = pl.pallas_call(
        encoder_block_kernel,
        out_shape=jax.ShapeDtypeStruct((b * s, d), jnp.float32),
        in_specs=[vmem_spec] * 13,
        out_specs=vmem_spec,
    )(x2d,
      params["attn_ln_w"], params["attn_ln_b"],
      w_qkv, b_qkv,
      params["w_o"], params["b_o"],
      params["mlp_ln_w"], params["mlp_ln_b"],
      params["w1"], params["b1"],
      params["w2"], params["b2"])
    return out2d.reshape(b, s, d)


def init_params(key):
    ks = jax.random.split(key, 8)
    scale = 0.02
    # weights stored as (in_features, out_features) for x @ W convenience
    return {
        "attn_ln_w": jnp.ones((1, D), jnp.float32),
        "attn_ln_b": jnp.zeros((1, D), jnp.float32),
        "w_qkv": scale * jax.random.normal(ks[0], (D, 3 * D), jnp.float32),
        "b_qkv": scale * jax.random.normal(ks[1], (1, 3 * D), jnp.float32),
        "w_o":   scale * jax.random.normal(ks[2], (D, D), jnp.float32),
        "b_o":   scale * jax.random.normal(ks[3], (1, D), jnp.float32),
        "mlp_ln_w": jnp.ones((1, D), jnp.float32),
        "mlp_ln_b": jnp.zeros((1, D), jnp.float32),
        "w1": scale * jax.random.normal(ks[4], (D, MLP), jnp.float32),
        "b1": scale * jax.random.normal(ks[5], (1, MLP), jnp.float32),
        "w2": scale * jax.random.normal(ks[6], (MLP, D), jnp.float32),
        "b2": scale * jax.random.normal(ks[7], (1, D), jnp.float32),
    }


if __name__ == "__main__":
    key = jax.random.PRNGKey(0)
    k_x, k_p = jax.random.split(key)
    x = jax.random.normal(k_x, (B, S, D), jnp.float32)
    params = init_params(k_p)

    out = transformer_encoder_block(x, params)
    jax.block_until_ready(out)
    assert out.shape == (B, S, D) and out.dtype == jnp.float32
    assert bool(jnp.all(jnp.isfinite(out)))
    print("KERNEL_OK")
</pallas_src>

<mosaic_0001>
module attributes {stable_mosaic.version = 11 : i64} {
  func.func @encoder_block_kernel(%arg0: memref<16x32xf32, #tpu.memory_space<vmem>>, %arg1: memref<1x32xf32, #tpu.memory_space<vmem>>, %arg2: memref<1x32xf32, #tpu.memory_space<vmem>>, %arg3: memref<32x96xf32, #tpu.memory_space<vmem>>, %arg4: memref<1x96xf32, #tpu.memory_space<vmem>>, %arg5: memref<32x32xf32, #tpu.memory_space<vmem>>, %arg6: memref<1x32xf32, #tpu.memory_space<vmem>>, %arg7: memref<1x32xf32, #tpu.memory_space<vmem>>, %arg8: memref<1x32xf32, #tpu.memory_space<vmem>>, %arg9: memref<32x64xf32, #tpu.memory_space<vmem>>, %arg10: memref<1x64xf32, #tpu.memory_space<vmem>>, %arg11: memref<64x32xf32, #tpu.memory_space<vmem>>, %arg12: memref<1x32xf32, #tpu.memory_space<vmem>>, %arg13: memref<16x32xf32, #tpu.memory_space<vmem>>) attributes {dimension_semantics = [], scalar_prefetch = 0 : i64, scratch_operands = 0 : i64, tpu.core_type = #tpu.core_type<tc>} {
    %c0 = arith.constant 0 : index
    %c0_0 = arith.constant 0 : index
    %0 = vector.load %arg0[%c0, %c0_0] : memref<16x32xf32, #tpu.memory_space<vmem>>, vector<16x32xf32>
    %c0_1 = arith.constant 0 : index
    %c0_2 = arith.constant 0 : index
    %1 = vector.load %arg1[%c0_1, %c0_2] : memref<1x32xf32, #tpu.memory_space<vmem>>, vector<1x32xf32>
    %2 = vector.shape_cast %1 : vector<1x32xf32> to vector<32xf32>
    %c0_3 = arith.constant 0 : index
    %c0_4 = arith.constant 0 : index
    %3 = vector.load %arg2[%c0_3, %c0_4] : memref<1x32xf32, #tpu.memory_space<vmem>>, vector<1x32xf32>
    %4 = vector.shape_cast %3 : vector<1x32xf32> to vector<32xf32>
    %cst = arith.constant dense<0.000000e+00> : vector<16xf32>
    %5 = vector.multi_reduction <add>, %0, %cst [1] : vector<16x32xf32> to vector<16xf32>
    %6 = vector.shape_cast %5 : vector<16xf32> to vector<16x1xf32>
    %cst_5 = arith.constant 3.200000e+01 : f32
    %7 = vector.broadcast %cst_5 : f32 to vector<16x1xf32>
    %8 = arith.divf %6, %7 : vector<16x1xf32>
    %9 = vector.broadcast %8 : vector<16x1xf32> to vector<16x32xf32>
    %10 = arith.subf %0, %9 : vector<16x32xf32>
    %11 = arith.mulf %10, %10 : vector<16x32xf32>
    %cst_6 = arith.constant dense<0.000000e+00> : vector<16xf32>
    %12 = vector.multi_reduction <add>, %11, %cst_6 [1] : vector<16x32xf32> to vector<16xf32>
    %13 = vector.shape_cast %12 : vector<16xf32> to vector<16x1xf32>
    %cst_7 = arith.constant 3.200000e+01 : f32
    %14 = vector.broadcast %cst_7 : f32 to vector<16x1xf32>
    %15 = arith.divf %13, %14 : vector<16x1xf32>
    %16 = vector.broadcast %8 : vector<16x1xf32> to vector<16x32xf32>
    %17 = arith.subf %0, %16 : vector<16x32xf32>
    %cst_8 = arith.constant 9.99999974E-6 : f32
    %18 = vector.broadcast %cst_8 : f32 to vector<16x1xf32>
    %19 = arith.addf %15, %18 : vector<16x1xf32>
    %20 = math.rsqrt %19 : vector<16x1xf32>
    %21 = vector.broadcast %20 : vector<16x1xf32> to vector<16x32xf32>
    %22 = arith.mulf %17, %21 : vector<16x32xf32>
    %23 = vector.shape_cast %2 : vector<32xf32> to vector<1x32xf32>
    %24 = vector.broadcast %23 : vector<1x32xf32> to vector<16x32xf32>
    %25 = arith.mulf %22, %24 : vector<16x32xf32>
    %26 = vector.shape_cast %4 : vector<32xf32> to vector<1x32xf32>
    %27 = vector.broadcast %26 : vector<1x32xf32> to vector<16x32xf32>
    %28 = arith.addf %25, %27 : vector<16x32xf32>
    %c0_9 = arith.constant 0 : index
    %c0_10 = arith.constant 0 : index
    %29 = vector.load %arg3[%c0_9, %c0_10] : memref<32x96xf32, #tpu.memory_space<vmem>>, vector<32x96xf32>
    %cst_11 = arith.constant dense<0.000000e+00> : vector<16x96xf32>
    %30 = tpu.matmul %28, %29, %cst_11 {dimension_numbers = #tpu.dot_dimension_numbers<[1], [0], [0], [1], [0, 0, 1, 1], [], []>} : vector<16x32xf32>, vector<32x96xf32>, vector<16x96xf32> -> vector<16x96xf32>
    %c0_12 = arith.constant 0 : index
    %c0_13 = arith.constant 0 : index
    %31 = vector.load %arg4[%c0_12, %c0_13] : memref<1x96xf32, #tpu.memory_space<vmem>>, vector<1x96xf32>
    %32 = vector.shape_cast %31 : vector<1x96xf32> to vector<96xf32>
    %33 = vector.shape_cast %32 : vector<96xf32> to vector<1x96xf32>
    %34 = vector.broadcast %33 : vector<1x96xf32> to vector<16x96xf32>
    %35 = arith.addf %30, %34 : vector<16x96xf32>
    %36 = vector.shape_cast %35 : vector<16x96xf32> to vector<2x8x96xf32>
    %37 = vector.extract_strided_slice %36 {offsets = [0, 0, 0], sizes = [2, 8, 32], strides = [1, 1, 1]} : vector<2x8x96xf32> to vector<2x8x32xf32>
    %38 = vector.extract_strided_slice %36 {offsets = [0, 0, 32], sizes = [2, 8, 32], strides = [1, 1, 1]} : vector<2x8x96xf32> to vector<2x8x32xf32>
    %39 = vector.extract_strided_slice %36 {offsets = [0, 0, 64], sizes = [2, 8, 32], strides = [1, 1, 1]} : vector<2x8x96xf32> to vector<2x8x32xf32>
    %40 = vector.extract_strided_slice %37 {offsets = [0, 0, 0], sizes = [2, 8, 8], strides = [1, 1, 1]} : vector<2x8x32xf32> to vector<2x8x8xf32>
    %41 = vector.extract_strided_slice %37 {offsets = [0, 0, 8], sizes = [2, 8, 8], strides = [1, 1, 1]} : vector<2x8x32xf32> to vector<2x8x8xf32>
    %42 = vector.extract_strided_slice %37 {offsets = [0, 0, 16], sizes = [2, 8, 8], strides = [1, 1, 1]} : vector<2x8x32xf32> to vector<2x8x8xf32>
    %43 = vector.extract_strided_slice %37 {offsets = [0, 0, 24], sizes = [2, 8, 8], strides = [1, 1, 1]} : vector<2x8x32xf32> to vector<2x8x8xf32>
    %44 = tpu.concatenate %40, %41, %42, %43 in 0 : vector<2x8x8xf32>, vector<2x8x8xf32>, vector<2x8x8xf32>, vector<2x8x8xf32> -> vector<8x8x8xf32>
    %45 = vector.extract_strided_slice %38 {offsets = [0, 0, 0], sizes = [2, 8, 8], strides = [1, 1, 1]} : vector<2x8x32xf32> to vector<2x8x8xf32>
    %46 = vector.extract_strided_slice %38 {offsets = [0, 0, 8], sizes = [2, 8, 8], strides = [1, 1, 1]} : vector<2x8x32xf32> to vector<2x8x8xf32>
    %47 = vector.extract_strided_slice %38 {offsets = [0, 0, 16], sizes = [2, 8, 8], strides = [1, 1, 1]} : vector<2x8x32xf32> to vector<2x8x8xf32>
    %48 = vector.extract_strided_slice %38 {offsets = [0, 0, 24], sizes = [2, 8, 8], strides = [1, 1, 1]} : vector<2x8x32xf32> to vector<2x8x8xf32>
    %49 = tpu.concatenate %45, %46, %47, %48 in 0 : vector<2x8x8xf32>, vector<2x8x8xf32>, vector<2x8x8xf32>, vector<2x8x8xf32> -> vector<8x8x8xf32>
    %50 = vector.extract_strided_slice %39 {offsets = [0, 0, 0], sizes = [2, 8, 8], strides = [1, 1, 1]} : vector<2x8x32xf32> to vector<2x8x8xf32>
    %51 = vector.extract_strided_slice %39 {offsets = [0, 0, 8], sizes = [2, 8, 8], strides = [1, 1, 1]} : vector<2x8x32xf32> to vector<2x8x8xf32>
    %52 = vector.extract_strided_slice %39 {offsets = [0, 0, 16], sizes = [2, 8, 8], strides = [1, 1, 1]} : vector<2x8x32xf32> to vector<2x8x8xf32>
    %53 = vector.extract_strided_slice %39 {offsets = [0, 0, 24], sizes = [2, 8, 8], strides = [1, 1, 1]} : vector<2x8x32xf32> to vector<2x8x8xf32>
    %54 = tpu.concatenate %50, %51, %52, %53 in 0 : vector<2x8x8xf32>, vector<2x8x8xf32>, vector<2x8x8xf32>, vector<2x8x8xf32> -> vector<8x8x8xf32>
    "tpu.trace_start"() <{level = 10 : i32, message = "gqd,gkd->gqk"}> : () -> ()
    %cst_14 = arith.constant dense<0.000000e+00> : vector<8x8x8xf32>
    %55 = tpu.matmul %44, %49, %cst_14 {dimension_numbers = #tpu.dot_dimension_numbers<[2], [2], [1], [1], [0, 0, 0, 1, 1, 1], [0], [0]>} : vector<8x8x8xf32>, vector<8x8x8xf32>, vector<8x8x8xf32> -> vector<8x8x8xf32>
    "tpu.trace_stop"() : () -> ()
    %cst_15 = arith.constant dense<0xFF800000> : vector<8x8xf32>
    %56 = vector.multi_reduction <maximumf>, %55, %cst_15 [2] : vector<8x8x8xf32> to vector<8x8xf32>
    %57 = vector.shape_cast %56 : vector<8x8xf32> to vector<8x8x1xf32>
    %58 = vector.broadcast %57 : vector<8x8x1xf32> to vector<8x8x8xf32>
    %59 = arith.subf %55, %58 : vector<8x8x8xf32>
    %60 = math.exp %59 : vector<8x8x8xf32>
    %cst_16 = arith.constant dense<0.000000e+00> : vector<8x8xf32>
    %61 = vector.multi_reduction <add>, %60, %cst_16 [2] : vector<8x8x8xf32> to vector<8x8xf32>
    %62 = vector.shape_cast %61 : vector<8x8xf32> to vector<8x8x1xf32>
    %63 = tpu.reciprocal %62 {approx = true} : vector<8x8x1xf32> -> vector<8x8x1xf32>
    %64 = vector.broadcast %63 : vector<8x8x1xf32> to vector<8x8x8xf32>
    %65 = arith.mulf %60, %64 : vector<8x8x8xf32>
    "tpu.trace_start"() <{level = 10 : i32, message = "gqk,gkd->gqd"}> : () -> ()
    %cst_17 = arith.constant dense<0.000000e+00> : vector<8x8x8xf32>
    %66 = tpu.matmul %65, %54, %cst_17 {dimension_numbers = #tpu.dot_dimension_numbers<[2], [1], [1], [2], [0, 0, 0, 1, 1, 2], [0], [0]>} : vector<8x8x8xf32>, vector<8x8x8xf32>, vector<8x8x8xf32> -> vector<8x8x8xf32>
    "tpu.trace_stop"() : () -> ()
    %67 = vector.extract_strided_slice %66 {offsets = [0, 0, 0], sizes = [2, 8, 8], strides = [1, 1, 1]} : vector<8x8x8xf32> to vector<2x8x8xf32>
    %68 = vector.extract_strided_slice %66 {offsets = [2, 0, 0], sizes = [2, 8, 8], strides = [1, 1, 1]} : vector<8x8x8xf32> to vector<2x8x8xf32>
    %69 = vector.extract_strided_slice %66 {offsets = [4, 0, 0], sizes = [2, 8, 8], strides = [1, 1, 1]} : vector<8x8x8xf32> to vector<2x8x8xf32>
    %70 = vector.extract_strided_slice %66 {offsets = [6, 0, 0], sizes = [2, 8, 8], strides = [1, 1, 1]} : vector<8x8x8xf32> to vector<2x8x8xf32>
    %71 = tpu.concatenate %67, %68, %69, %70 in 2 : vector<2x8x8xf32>, vector<2x8x8xf32>, vector<2x8x8xf32>, vector<2x8x8xf32> -> vector<2x8x32xf32>
    %72 = vector.shape_cast %71 : vector<2x8x32xf32> to vector<16x32xf32>
    %c0_18 = arith.constant 0 : index
    %c0_19 = arith.constant 0 : index
    %73 = vector.load %arg5[%c0_18, %c0_19] : memref<32x32xf32, #tpu.memory_space<vmem>>, vector<32x32xf32>
    %cst_20 = arith.constant dense<0.000000e+00> : vector<16x32xf32>
    %74 = tpu.matmul %72, %73, %cst_20 {dimension_numbers = #tpu.dot_dimension_numbers<[1], [0], [0], [1], [0, 0, 1, 1], [], []>} : vector<16x32xf32>, vector<32x32xf32>, vector<16x32xf32> -> vector<16x32xf32>
    %c0_21 = arith.constant 0 : index
    %c0_22 = arith.constant 0 : index
    %75 = vector.load %arg6[%c0_21, %c0_22] : memref<1x32xf32, #tpu.memory_space<vmem>>, vector<1x32xf32>
    %76 = vector.shape_cast %75 : vector<1x32xf32> to vector<32xf32>
    %77 = vector.shape_cast %76 : vector<32xf32> to vector<1x32xf32>
    %78 = vector.broadcast %77 : vector<1x32xf32> to vector<16x32xf32>
    %79 = arith.addf %74, %78 : vector<16x32xf32>
    %80 = arith.addf %79, %0 : vector<16x32xf32>
    %c0_23 = arith.constant 0 : index
    %c0_24 = arith.constant 0 : index
    %81 = vector.load %arg7[%c0_23, %c0_24] : memref<1x32xf32, #tpu.memory_space<vmem>>, vector<1x32xf32>
    %82 = vector.shape_cast %81 : vector<1x32xf32> to vector<32xf32>
    %c0_25 = arith.constant 0 : index
    %c0_26 = arith.constant 0 : index
    %83 = vector.load %arg8[%c0_25, %c0_26] : memref<1x32xf32, #tpu.memory_space<vmem>>, vector<1x32xf32>
    %84 = vector.shape_cast %83 : vector<1x32xf32> to vector<32xf32>
    %cst_27 = arith.constant dense<0.000000e+00> : vector<16xf32>
    %85 = vector.multi_reduction <add>, %80, %cst_27 [1] : vector<16x32xf32> to vector<16xf32>
    %86 = vector.shape_cast %85 : vector<16xf32> to vector<16x1xf32>
    %cst_28 = arith.constant 3.200000e+01 : f32
    %87 = vector.broadcast %cst_28 : f32 to vector<16x1xf32>
    %88 = arith.divf %86, %87 : vector<16x1xf32>
    %89 = vector.broadcast %88 : vector<16x1xf32> to vector<16x32xf32>
    %90 = arith.subf %80, %89 : vector<16x32xf32>
    %91 = arith.mulf %90, %90 : vector<16x32xf32>
    %cst_29 = arith.constant dense<0.000000e+00> : vector<16xf32>
    %92 = vector.multi_reduction <add>, %91, %cst_29 [1] : vector<16x32xf32> to vector<16xf32>
    %93 = vector.shape_cast %92 : vector<16xf32> to vector<16x1xf32>
    %cst_30 = arith.constant 3.200000e+01 : f32
    %94 = vector.broadcast %cst_30 : f32 to vector<16x1xf32>
    %95 = arith.divf %93, %94 : vector<16x1xf32>
    %96 = vector.broadcast %88 : vector<16x1xf32> to vector<16x32xf32>
    %97 = arith.subf %80, %96 : vector<16x32xf32>
    %cst_31 = arith.constant 9.99999974E-6 : f32
    %98 = vector.broadcast %cst_31 : f32 to vector<16x1xf32>
    %99 = arith.addf %95, %98 : vector<16x1xf32>
    %100 = math.rsqrt %99 : vector<16x1xf32>
    %101 = vector.broadcast %100 : vector<16x1xf32> to vector<16x32xf32>
    %102 = arith.mulf %97, %101 : vector<16x32xf32>
    %103 = vector.shape_cast %82 : vector<32xf32> to vector<1x32xf32>
    %104 = vector.broadcast %103 : vector<1x32xf32> to vector<16x32xf32>
    %105 = arith.mulf %102, %104 : vector<16x32xf32>
    %106 = vector.shape_cast %84 : vector<32xf32> to vector<1x32xf32>
    %107 = vector.broadcast %106 : vector<1x32xf32> to vector<16x32xf32>
    %108 = arith.addf %105, %107 : vector<16x32xf32>
    %c0_32 = arith.constant 0 : index
    %c0_33 = arith.constant 0 : index
    %109 = vector.load %arg9[%c0_32, %c0_33] : memref<32x64xf32, #tpu.memory_space<vmem>>, vector<32x64xf32>
    %cst_34 = arith.constant dense<0.000000e+00> : vector<16x64xf32>
    %110 = tpu.matmul %108, %109, %cst_34 {dimension_numbers = #tpu.dot_dimension_numbers<[1], [0], [0], [1], [0, 0, 1, 1], [], []>} : vector<16x32xf32>, vector<32x64xf32>, vector<16x64xf32> -> vector<16x64xf32>
    %c0_35 = arith.constant 0 : index
    %c0_36 = arith.constant 0 : index
    %111 = vector.load %arg10[%c0_35, %c0_36] : memref<1x64xf32, #tpu.memory_space<vmem>>, vector<1x64xf32>
    %112 = vector.shape_cast %111 : vector<1x64xf32> to vector<64xf32>
    %113 = vector.shape_cast %112 : vector<64xf32> to vector<1x64xf32>
    %114 = vector.broadcast %113 : vector<1x64xf32> to vector<16x64xf32>
    %115 = arith.addf %110, %114 : vector<16x64xf32>
    %cst_37 = arith.constant 5.000000e-01 : f32
    %116 = vector.broadcast %cst_37 : f32 to vector<16x64xf32>
    %117 = arith.mulf %116, %115 : vector<16x64xf32>
    %cst_38 = arith.constant 0.707106769 : f32
    %118 = vector.broadcast %cst_38 : f32 to vector<16x64xf32>
    %119 = arith.mulf %115, %118 : vector<16x64xf32>
    %120 = math.erf %119 : vector<16x64xf32>
    %cst_39 = arith.constant 1.000000e+00 : f32
    %121 = vector.broadcast %cst_39 : f32 to vector<16x64xf32>
    %122 = arith.addf %121, %120 : vector<16x64xf32>
    %123 = arith.mulf %117, %122 : vector<16x64xf32>
    %c0_40 = arith.constant 0 : index
    %c0_41 = arith.constant 0 : index
    %124 = vector.load %arg11[%c0_40, %c0_41] : memref<64x32xf32, #tpu.memory_space<vmem>>, vector<64x32xf32>
    %cst_42 = arith.constant dense<0.000000e+00> : vector<16x32xf32>
    %125 = tpu.matmul %123, %124, %cst_42 {dimension_numbers = #tpu.dot_dimension_numbers<[1], [0], [0], [1], [0, 0, 1, 1], [], []>} : vector<16x64xf32>, vector<64x32xf32>, vector<16x32xf32> -> vector<16x32xf32>
    %c0_43 = arith.constant 0 : index
    %c0_44 = arith.constant 0 : index
    %126 = vector.load %arg12[%c0_43, %c0_44] : memref<1x32xf32, #tpu.memory_space<vmem>>, vector<1x32xf32>
    %127 = vector.shape_cast %126 : vector<1x32xf32> to vector<32xf32>
    %128 = vector.shape_cast %127 : vector<32xf32> to vector<1x32xf32>
    %129 = vector.broadcast %128 : vector<1x32xf32> to vector<16x32xf32>
    %130 = arith.addf %125, %129 : vector<16x32xf32>
    %131 = arith.addf %130, %80 : vector<16x32xf32>
    %c0_45 = arith.constant 0 : index
    %c0_46 = arith.constant 0 : index
    %132 = vector.load %arg13[%c0_45, %c0_46] : memref<16x32xf32, #tpu.memory_space<vmem>>, vector<16x32xf32>
    tpu.vector_store %arg13[%c0_45, %c0_46], %131 {strides = array<i32>} : memref<16x32xf32, #tpu.memory_space<vmem>>, vector<16x32xf32>,
    return
  }
}

</mosaic_0001>

<bundles_post_ra>
// kernel: tpu_custom_call.1
= control target key start
LH: loop header
LB: loop body
LE: loop exit
PB: predicated region body
PF: predicated region fallthrough
CT: control target
= control target key end

     0   :  { %18 = vsyncpa [#allocation3], 0  ;;  %s1555_s0 = inlined_call_operand.hbm [shape: f32[16,32], index: 0, kind: input, shape index: {}]   ;;  %s1556_s1 = inlined_call_operand.hbm [shape: f32[1,32], index: 1, kind: input, shape index: {}]   ;;  %s1557_s2 = inlined_call_operand.vmem [shape: f32[1,32], index: 2, kind: input, shape index: {}]   ;;  %s1558_s3 = inlined_call_operand.vmem [shape: f32[32,96], index: 3, kind: input, shape index: {}]   ;;  %s1559_s4 = inlined_call_operand.vmem [shape: f32[1,96], index: 4, kind: input, shape index: {}]   ;;  %s1560_s5 = inlined_call_operand.vmem [shape: f32[32,32], index: 5, kind: input, shape index: {}]   ;;  %s1561_s6 = inlined_call_operand.vmem [shape: f32[1,32], index: 6, kind: input, shape index: {}]   ;;  %s1562_s7 = inlined_call_operand.vmem [shape: f32[1,32], index: 7, kind: input, shape index: {}]   ;;  %s1563_s8 = inlined_call_operand.vmem [shape: f32[1,32], index: 8, kind: input, shape index: {}]   ;;  %s1564_s9 = inlined_call_operand.vmem [shape: f32[32,64], index: 9, kind: input, shape index: {}]   ;;  %s1565_s10 = inlined_call_operand.vmem [shape: f32[1,64], index: 10, kind: input, shape index: {}]   ;;  %s1566_s11 = inlined_call_operand.vmem [shape: f32[64,32], index: 11, kind: input, shape index: {}]   ;;  %s1567_s12 = inlined_call_operand.vmem [shape: f32[1,32], index: 12, kind: input, shape index: {}]   ;;  %s1568_s13 = inlined_call_operand.hbm [shape: f32[16,32], index: 13, kind: output, shape index: {}]  }
   0x1   :  { %19 = vsyncpa [#allocation6], 0 }
   0x2   :  { %20 = vsyncpa [#allocation4], 0  ;;  %s25_s27 = sshll.u32 %s1555_s0, 4  ;;  %s1209_s28 = smov [#allocation2]   ;;  %s26_s27 = int_to_ptr.hbm [resolvable:$true] %s25_s27 }
   0x3   :  { %s27_s29 = sshll.u32 %s1209_s28, 4  ;;  %s39_s15 = sshll.u32 %s1556_s1, 4  ;;  %s28_s29 = int_to_ptr.vmem [resolvable:$true] %s27_s29  ;;  %s40_s15 = int_to_ptr.hbm [resolvable:$true] %s39_s15 }
   0x4   :  { %s1210_s16 = smov 128   ;;  %s1211_s17 = smov 8  }
   0x5   :  { %33 = dma.hbm_to_vmem [thread:$0]  %s26_s27, 256, %s28_s29, [#allocation3], %s1210_s16, %s1210_s16, %s1211_s17  }
   0x6   :  { %s1212_s18 = smov [#allocation5]  }
   0x7   :  { %s41_s19 = sshll.u32 %s1212_s18, 4  ;;  %s42_s19 = int_to_ptr.vmem [resolvable:$true] %s41_s19 }
   0x8   :  { %44 = dma.hbm_to_vmem [thread:$0]  %s40_s15, 16, %s42_s19, [#allocation6]  }
   0x9   :  { %1203 = dma.done.wait [#allocation3], 256  }
   0xa   :  { %1204 = vsyncadd [#allocation3], 4294967040 }
   0xb   :  { %1205 = dma.done.wait [#allocation6], 16  }
   0xc   :  { %1206 = vsyncadd [#allocation6], 4294967280  ;;  %vm79_vm0 = vcmask 261120   ;;  %v1301_v0 = vld [vmem:[#allocation2] sm:$0xff]  ;;  %v1305_v2 = vld [vmem:[#allocation2 + $0x8] sm:$0xff]  ;;  %v1213_v4 = vmov 32.0  }
   0xd   :  { %v80_v1 = vsel %vm79_vm0, %v1301_v0, 0.0  ;;  %v83_v3 = vsel %vm79_vm0, %v1305_v2, 0.0  ;;  %1085 = vrcp.f32 %v1213_v4  ;;  %v144_v21 = vld [vmem:[%s1558_s3 + $0x18] sm:$0xff]  ;;  %v143_v22 = vld [vmem:[%s1558_s3 + $0x10] sm:$0xff]  ;;  %v142_v23 = vld [vmem:[%s1558_s3 + $0x8] sm:$0xff]  ;;  %s1215_s29 = smov 112  }
   0xe   :  { %81 = vadd.xlane.f32.xlu0 %v80_v1  ;;  %167 = vmatpush.msra.mxu0 %v144_v21  ;;  %v141_v24 = vld [vmem:[%s1558_s3] sm:$0xff]  ;;  %v1077_v39 = vld [vmem:[#allocation5] ss:$0 sm:$0xff]  ;;  %s1216_s30 = smov 104   ;;  %vm194_vm8 = vcmask 64512   ;;  %s1218_s14 = smov 64  }
   0xf   :  { %v1078_v43 = vld [vmem:[%s1557_s2] ss:$0 sm:$0xff]  ;;  %s1214_s2 = smov 120   ;;  %s1219_s15 = smov 24   ;;  %vm723_vm9 = vcmask 130048   ;;  %vm726_vm10 = vcmask 195584  }
  0x10   :  { %168 = vmatpush.msra.mxu0 %v143_v22  ;;  %v1079_v53 = vld [vmem:[%s1559_s4] ss:$0 sm:$0xff]  ;;  %s1217_s4 = smov 96   ;;  %s1220_s18 = smov 16  }
  0x12   :  { %169 = vmatpush.msra.mxu0 %v142_v23 }
  0x13   :  { %v1086_v5 = vpop.eup %1085 }
  0x14   :  { %v87_v6 = vmul.f32 32.0, %v1086_v5  ;;  %vm91_vm1 = vweird.f32 %v1086_v5  ;;  %170 = vmatpush.msra.mxu0 %v141_v24 }
  0x16   :  { %84 = vadd.xlane.f32.xlu0 %v83_v3  ;;  %v88_v7 = vsub.f32 1.0, %v87_v6 }
  0x18   :  { %v89_v8 = vmul.f32 %v1086_v5, %v88_v7 }
  0x1a   :  { %v90_v9 = vadd.f32 %v1086_v5, %v89_v8 }
  0x1c   :  { %v1309_v10 = vsel %vm91_vm1, %v1086_v5, %v90_v9 }
  0x81   :  { %v82_v11 = vpop.xlane.xlu0 %81 }
  0x82   :  { %v93_v12 = vmul.f32 %v1309_v10, %v82_v11 }
  0x84   :  { %v95_v13 = vsub.f32 %v1301_v0, %v93_v12 }
  0x86   :  { %v97_v14 = vmul.f32 %v95_v13, %v95_v13 }
  0x88   :  { %v99_v15 = vsel %vm79_vm0, %v97_v14, 0.0 }
  0x89   :  { %100 = vadd.xlane.f32.xlu1 %v99_v15  ;;  %v85_v16 = vpop.xlane.xlu0 %84 }
  0x8a   :  { %v94_v17 = vmul.f32 %v1309_v10, %v85_v16 }
  0x8c   :  { %v96_v18 = vsub.f32 %v1305_v2, %v94_v17 }
  0x8e   :  { %v98_v19 = vmul.f32 %v96_v18, %v96_v18 }
  0x90   :  { %v102_v20 = vsel %vm79_vm0, %v98_v19, 0.0 }
  0x91   :  { %103 = vadd.xlane.f32.xlu1 %v102_v20 }
  0xfc   :  { %v101_v25 = vpop.xlane.xlu1 %100 }
  0xfd   :  { %v105_v26 = vmul.f32 %v101_v25, %v1309_v10 }
  0xff   :  { %v107_v27 = vadd.f32 1e-05, %v105_v26 }
 0x101   :  { %1087 = vrsqrt.f32 %v107_v27  ;;  %vm115_vm3 = vweird.f32 %v107_v27 }
 0x104   :  { %v104_v28 = vpop.xlane.xlu1 %103 }
 0x105   :  { %v106_v29 = vmul.f32 %v104_v28, %v1309_v10 }
 0x107   :  { %v1088_v30 = vpop.eup %1087  ;;  %v108_v31 = vadd.f32 1e-05, %v106_v29 }
 0x108   :  { %v110_v32 = vmul.f32 %v1088_v30, %v107_v27  ;;  %vm116_vm2 = vweird.f32 %v1088_v30 }
 0x109   :  { %1089 = vrsqrt.f32 %v108_v31  ;;  %vm117_vm4 = vmor %vm115_vm3, %vm116_vm2  ;;  %vm125_vm6 = vweird.f32 %v108_v31 }
 0x10a   :  { %v111_v33 = vmul.f32 %v1088_v30, %v110_v32 }
 0x10c   :  { %v112_v34 = vmul.f32 0.5, %v111_v33 }
 0x10e   :  { %v113_v35 = vsub.f32 1.5, %v112_v34 }
 0x10f   :  { %v1090_v36 = vpop.eup %1089 }
 0x110   :  { %v114_v37 = vmul.f32 %v1088_v30, %v113_v35  ;;  %v120_v38 = vmul.f32 %v1090_v36, %v108_v31  ;;  %vm126_vm5 = vweird.f32 %v1090_v36 }
 0x111   :  { %vm127_vm7 = vmor %vm125_vm6, %vm126_vm5  ;;  %vm961_vm6 = vcmask 523264  }
 0x112   :  { %v118_v40 = vsel %vm117_vm4, %v1088_v30, %v114_v37  ;;  %v121_v41 = vmul.f32 %v1090_v36, %v120_v38 }
 0x113   :  { %v129_v42 = vmul.f32 %v118_v40, %v95_v13 }
 0x114   :  { %v122_v44 = vmul.f32 0.5, %v121_v41 }
 0x115   :  { %v134_v45 = vmul.f32 %v1077_v39, %v129_v42 }
 0x116   :  { %v123_v46 = vsub.f32 1.5, %v122_v44 }
 0x117   :  { %v139_v47 = vadd.f32 %v1078_v43, %v134_v45 }
 0x118   :  { %v124_v48 = vmul.f32 %v1090_v36, %v123_v46 }
 0x119   :  { %1015 = vmatmul.msk.f32.vlgmr.msra.gmra.mxu0 %vm79_vm0, %v139_v47 }
 0x11a   :  { %v128_v49 = vsel %vm127_vm7, %v1090_v36, %v124_v48 }
 0x11b   :  { %v130_v50 = vmul.f32 %v128_v49, %v96_v18 }
 0x11d   :  { %v135_v51 = vmul.f32 %v1077_v39, %v130_v50 }
 0x11f   :  { %v140_v52 = vadd.f32 %v1078_v43, %v135_v51 }
 0x121   :  { %1016 = vmatmul.msk.f32.gmra.mxu0 %vm79_vm0, %v140_v52 }
 0x196   :  { %v172_v54 = vpop.f32.mrf.mxu0 }
 0x197   :  { %v1339_v55 = vadd.f32 %v1079_v53, %v172_v54 }
 0x199   :  { %180 = vrot.lane.b32.xlu2 %v1339_v55, %s1214_s2 }
 0x19e   :  { %v175_v56 = vpop.f32.mrf.mxu0 }
 0x19f   :  { %v1342_v57 = vadd.f32 %v1079_v53, %v175_v56 }
 0x1a1   :  { %184 = vrot.lane.b32.xlu2 %v1339_v55, %s1215_s29  ;;  %190 = vrot.lane.b32.xlu1 %v1342_v57, %s1216_s30 }
 0x1a2   :  { %182 = vrot.lane.b32.xlu0 %v1342_v57, %s1214_s2  ;;  %s1221_s2 = smov [#allocation7]  }
 0x1a9   :  { %188 = vrot.lane.b32.xlu2 %v1339_v55, %s1216_s30 }
 0x1aa   :  { %219 = vrot.lane.b32.xlu0 %v1342_v57, %s1217_s4 }
 0x1b1   :  { %186 = vrot.lane.b32.xlu2 %v1342_v57, %s1215_s29  ;;  %s999_s29 = sshll.u32 %s1221_s2, 4  ;;  %s1000_s29 = int_to_ptr.vmem [resolvable:$true] %s999_s29 }
 0x1b9   :  { %192 = vrot.lane.b32.xlu2 %v1339_v55, %s1217_s4 }
 0x1f3   :  { %v1351_v58 = vpop.permute.xlu2 %180 }
 0x1f4   :  { %245 = vrot.lane.b32.xlu2 %v1351_v58, %s1217_s4  ;;  %v1062_v37 = vpack.i.bf16 %v1351_v58, %v1339_v55 }
 0x1fb   :  { %v1354_v59 = vpop.permute.xlu2 %184 }
 0x1fc   :  { %297 = vrot.lane.b32.xlu1 %v1354_v59, %s1217_s4 }
 0x203   :  { %v1357_v60 = vpop.permute.xlu2 %188 }
 0x204   :  { %349 = vrot.lane.b32.xlu1 %v1357_v60, %s1217_s4  ;;  %v1072_v45 = vpack.i.bf16 %v1357_v60, %v1342_v57 }
 0x20b   :  { %v1360_v61 = vpop.permute.xlu2 %186 }
 0x213   :  { %v193_v62 = vpop.permute.xlu2 %192  ;;  %v1362_v63 = vpop.permute.xlu1 %190 }
 0x214   :  { %v1364_v1 = vpop.permute.xlu0 %182  ;;  %1017 = vmatpush.xpose.msk.msra.mxu2 %vm194_vm8, %v193_v62  ;;  %375 = vrot.lane.b32.xlu2 %v1362_v63, %s1217_s4 }
 0x215   :  { %271 = vrot.lane.b32.xlu0 %v1364_v1, %s1217_s4 }
 0x217   :  { %1018 = vmatmul.msk.f32.vlgmr.msra.gmra.mxu2 %vm194_vm8, %v1339_v55 }
 0x21c   :  { %v220_v3 = vpop.permute.xlu0 %219 }
 0x21d   :  { %323 = vrot.lane.b32.xlu0 %v1360_v61, %s1217_s4  ;;  %1019 = vmatpush.xpose.msk.msrb.mxu2 %vm194_vm8, %v220_v3 }
 0x220   :  { %1020 = vmatmul.msk.f32.vlgmr.msrb.gmra.mxu2 %vm194_vm8, %v1342_v57 }
 0x24e   :  { %v246_v4 = vpop.permute.xlu2 %245 }
 0x24f   :  { %1021 = vmatpush.xpose.msk.msra.mxu3 %vm194_vm8, %v246_v4 }
 0x252   :  { %1022 = vmatmul.msk.f32.vlgmr.msra.gmra.mxu3 %vm194_vm8, %v1351_v58 }
 0x26e   :  { %v376_v5 = vpop.permute.xlu2 %375  ;;  %v298_v6 = vpop.permute.xlu1 %297 }
 0x26f   :  { %1025 = vmatpush.xpose.msk.msra.mxu2 %vm194_vm8, %v298_v6 }
 0x272   :  { %1026 = vmatmul.msk.f32.vlgmr.msra.gmra.mxu2 %vm194_vm8, %v1354_v59 }
 0x273   :  { %1031 = vmatpush.xpose.msk.msrb.mxu2 %vm194_vm8, %v376_v5 }
 0x276   :  { %v350_v8 = vpop.permute.xlu1 %349 }
 0x27a   :  { %1032 = vmatmul.msk.f32.vlgmr.msrb.gmra.mxu2 %vm194_vm8, %v1362_v63 }
 0x287   :  { %v272_v7 = vpop.permute.xlu0 %271 }
 0x288   :  { %1023 = vmatpush.xpose.msk.msra.mxu1 %vm194_vm8, %v272_v7 }
 0x28b   :  { %1024 = vmatmul.msk.f32.vlgmr.msra.gmra.mxu1 %vm194_vm8, %v1364_v1 }
 0x28c   :  { %1029 = vmatpush.xpose.msk.msrb.mxu1 %vm194_vm8, %v350_v8 }
 0x28f   :  { %v324_v9 = vpop.permute.xlu0 %323 }
 0x290   :  { %1027 = vmatpush.xpose.msk.msrb.mxu3 %vm194_vm8, %v324_v9 }
 0x293   :  { %1028 = vmatmul.msk.f32.vlgmr.msrb.gmra.mxu3 %vm194_vm8, %v1360_v61  ;;  %1030 = vmatmul.msk.f32.vlgmr.msrb.gmra.mxu1 %vm194_vm8, %v1357_v60 }
 0x29a   :  { %v216_v11 = vpop.f32.mrf.mxu2 }
 0x29b   :  { %v401_v12 = vsel %vm194_vm8, %v216_v11, -inf }
 0x29c   :  { %402 = vmax.xlane.f32.xlu2 %v401_v12 }
 0x2a3   :  { %v242_v13 = vpop.f32.mrf.mxu2 }
 0x2a4   :  { %v404_v14 = vsel %vm194_vm8, %v242_v13, -inf }
 0x2a5   :  { %405 = vmax.xlane.f32.xlu1 %v404_v14 }
 0x2d5   :  { %v268_v15 = vpop.f32.mrf.mxu3 }
 0x2d6   :  { %v407_v16 = vsel %vm194_vm8, %v268_v15, -inf }
 0x2d7   :  { %408 = vmax.xlane.f32.xlu1 %v407_v16 }
 0x2f5   :  { %v320_v17 = vpop.f32.mrf.mxu2 }
 0x2f6   :  { %v413_v18 = vsel %vm194_vm8, %v320_v17, -inf }
 0x2f7   :  { %414 = vmax.xlane.f32.xlu0 %v413_v18 }
 0x2fd   :  { %v398_v21 = vpop.f32.mrf.mxu2 }
 0x2fe   :  { %v422_v25 = vsel %vm194_vm8, %v398_v21, -inf }
 0x308   :  { %v294_v19 = vpop.f32.mrf.mxu1 }
 0x309   :  { %v410_v20 = vsel %vm194_vm8, %v294_v19, -inf }
 0x30a   :  { %411 = vmax.xlane.f32.xlu2 %v410_v20 }
 0x30f   :  { %v403_v22 = vpop.xlane.xlu2 %402 }
 0x310   :  { %v425_v23 = vsub.f32 %v216_v11, %v403_v22  ;;  %v372_v24 = vpop.f32.mrf.mxu1 }
 0x311   :  { %v419_v26 = vsel %vm194_vm8, %v372_v24, -inf }
 0x312   :  { %v433_v27 = vmul.f32 1.442695, %v425_v23  ;;  %423 = vmax.xlane.f32.xlu2 %v422_v25  ;;  %420 = vmax.xlane.f32.xlu0 %v419_v26 }
 0x314   :  { %1091 = vpow2.f32 %v433_v27 }
 0x316   :  { %v346_v28 = vpop.f32.mrf.mxu3 }
 0x317   :  { %v416_v29 = vsel %vm194_vm8, %v346_v28, -inf }
 0x318   :  { %v406_v30 = vpop.xlane.xlu1 %405  ;;  %417 = vmax.xlane.f32.xlu1 %v416_v29 }
 0x319   :  { %v426_v31 = vsub.f32 %v242_v13, %v406_v30 }
 0x31a   :  { %v1092_v32 = vpop.eup %1091 }
 0x31b   :  { %v435_v33 = vmul.f32 1.442695, %v426_v31  ;;  %v449_v34 = vsel %vm194_vm8, %v1092_v32, 0.0 }
 0x31c   :  { %450 = vadd.xlane.f32.xlu0 %v449_v34 }
 0x31d   :  { %1093 = vpow2.f32 %v435_v33 }
 0x323   :  { %v1402_v35 = vpop.eup %1093 }
 0x324   :  { %v452_v36 = vsel %vm194_vm8, %v1402_v35, 0.0 }
 0x325   :  { %453 = vadd.xlane.f32.xlu1 %v452_v36 }
 0x32a   :  { %1063 = vrot.lane.b32.xlu2 %v1062_v37, %s1218_s14 }
 0x34a   :  { %v409_v38 = vpop.xlane.xlu1 %408 }
 0x34b   :  { %v427_v39 = vsub.f32 %v268_v15, %v409_v38 }
 0x34d   :  { %v437_v40 = vmul.f32 1.442695, %v427_v39 }
 0x34f   :  { %1095 = vpow2.f32 %v437_v40 }
 0x355   :  { %v1096_v41 = vpop.eup %1095 }
 0x356   :  { %v455_v42 = vsel %vm194_vm8, %v1096_v41, 0.0 }
 0x357   :  { %456 = vadd.xlane.f32.xlu2 %v455_v42 }
 0x36a   :  { %v415_v43 = vpop.xlane.xlu0 %414 }
 0x36b   :  { %v429_v44 = vsub.f32 %v320_v17, %v415_v43  ;;  %v1067_v17 = vpack.i.bf16 %v1364_v1, %v1354_v59 }
 0x36d   :  { %v441_v46 = vmul.f32 1.442695, %v429_v44 }
 0x36f   :  { %1097 = vpow2.f32 %v441_v46  ;;  %1073 = vrot.lane.b32.xlu2 %v1072_v45, %s1218_s14 }
 0x375   :  { %v1413_v47 = vpop.eup %1097 }
 0x376   :  { %v461_v48 = vsel %vm194_vm8, %v1413_v47, 0.0 }
 0x377   :  { %619 = vrot.lane.b32.xlu2 %v1360_v61, %s1218_s14  ;;  %462 = vadd.xlane.f32.xlu1 %v461_v48 }
 0x37d   :  { %v412_v49 = vpop.xlane.xlu2 %411 }
 0x37e   :  { %v428_v50 = vsub.f32 %v294_v19, %v412_v49 }
 0x380   :  { %v439_v51 = vmul.f32 1.442695, %v428_v50 }
 0x382   :  { %1099 = vpow2.f32 %v439_v51  ;;  %v732_v51 = vld [vmem:[%s1560_s5 + $0x18] sm:$0xff] }
 0x385   :  { %v424_v52 = vpop.xlane.xlu2 %423  ;;  %v421_v53 = vpop.xlane.xlu0 %420 }
 0x386   :  { %v432_v54 = vsub.f32 %v398_v21, %v424_v52  ;;  %v431_v55 = vsub.f32 %v372_v24, %v421_v53  ;;  %v731_v53 = vld [vmem:[%s1560_s5 + $0x10] sm:$0xff] }
 0x388   :  { %v1419_v56 = vpop.eup %1099  ;;  %v447_v57 = vmul.f32 1.442695, %v432_v54  ;;  %v445_v58 = vmul.f32 1.442695, %v431_v55  ;;  %v730_v54 = vld [vmem:[%s1560_s5 + $0x8] sm:$0xff]  ;;  %v729_v55 = vld [vmem:[%s1560_s5] sm:$0xff] }
 0x389   :  { %v458_v60 = vsel %vm194_vm8, %v1419_v56, 0.0 }
 0x38a   :  { %1101 = vpow2.f32 %v447_v57  ;;  %459 = vadd.xlane.f32.xlu0 %v458_v60 }
 0x38b   :  { %1103 = vpow2.f32 %v445_v58  ;;  %v418_v61 = vpop.xlane.xlu1 %417 }
 0x38c   :  { %v430_v62 = vsub.f32 %v346_v28, %v418_v61 }
 0x38d   :  { %v1064_v3 = vpop.permute.xlu2 %1063 }
 0x38e   :  { %v443_v4 = vmul.f32 1.442695, %v430_v62  ;;  %v1066_v5 = vunpack.i.h.bf16 %v1064_v3  ;;  %v1065_v6 = vunpack.i.l.bf16 %v1064_v3 }
 0x38f   :  { %v451_v7 = vpop.xlane.xlu0 %450 }
 0x390   :  { %v1423_v8 = vpop.eup %1101  ;;  %1105 = vpow2.f32 %v443_v4  ;;  %510 = vmatpush.msra.mxu3 %v1065_v6  ;;  %562 = vmatpush.msra.mxu1 %v1066_v5 }
 0x391   :  { %v1104_v9 = vpop.eup %1103  ;;  %1107 = vrcp.f32 %v451_v7  ;;  %v470_v11 = vsel %vm194_vm8, %v1423_v8, 0.0 }
 0x392   :  { %471 = vadd.xlane.f32.xlu1 %v470_v11  ;;  %v467_v12 = vsel %vm194_vm8, %v1104_v9, 0.0 }
 0x393   :  { %468 = vadd.xlane.f32.xlu0 %v467_v12 }
 0x396   :  { %v1106_v13 = vpop.eup %1105 }
 0x397   :  { %v1108_v14 = vpop.eup %1107  ;;  %v464_v16 = vsel %vm194_vm8, %v1106_v13, 0.0 }
 0x398   :  { %v481_v15 = vmul.f32 %v1108_v14, %v1092_v32  ;;  %v454_v18 = vpop.xlane.xlu1 %453 }
 0x399   :  { %1109 = vrcp.f32 %v454_v18 }
 0x39a   :  { %465 = vadd.xlane.f32.xlu1 %v464_v16  ;;  %1033 = vmatmul.msk.f32.vlgmr.msra.gmra.mxu3 %vm194_vm8, %v481_v15 }
 0x39f   :  { %v1110_v20 = vpop.eup %1109 }
 0x3a0   :  { %v482_v26 = vmul.f32 %v1110_v20, %v1402_v35 }
 0x3a7   :  { %1068 = vrot.lane.b32.xlu0 %v1067_v17, %s1218_s14 }
 0x3b3   :  { %671 = vrot.lane.b32.xlu1 %v1362_v63, %s1218_s14  ;;  %s1001_s14 = sshll.u32 %s1568_s13, 4  ;;  %s1002_s14 = int_to_ptr.hbm [resolvable:$true] %s1001_s14 }
 0x3ca   :  { %v457_v19 = vpop.xlane.xlu2 %456 }
 0x3cb   :  { %1111 = vrcp.f32 %v457_v19 }
 0x3d1   :  { %v1112_v21 = vpop.eup %1111 }
 0x3d2   :  { %v483_v22 = vmul.f32 %v1112_v21, %v1096_v41  ;;  %v1074_v23 = vpop.permute.xlu2 %1073 }
 0x3d3   :  { %v1076_v24 = vunpack.i.h.bf16 %v1074_v23  ;;  %v1075_v25 = vunpack.i.l.bf16 %v1074_v23 }
 0x3d4   :  { %1035 = vmatmul.msk.f32.vlgmr.msra.gmra.mxu1 %vm194_vm8, %v483_v22 }
 0x3d5   :  { %536 = vmatpush.msrb.mxu0 %v1075_v25  ;;  %666 = vmatpush.msrb.mxu1 %v1076_v24 }
 0x3d6   :  { %1034 = vmatmul.msk.f32.vlgmr.msrb.gmra.mxu0 %vm194_vm8, %v482_v26 }
 0x3da   :  { %v620_v59 = vpop.permute.xlu2 %619 }
 0x3db   :  { %640 = vmatpush.msra.mxu0 %v620_v59  ;;  %v827_v59 = vld [vmem:[%s1564_s9 + $0x18] sm:$0xff] }
 0x3dd   :  { %850 = vmatpush.msrb.mxu0 %v827_v59 }
 0x3ea   :  { %v463_v63 = vpop.xlane.xlu1 %462 }
 0x3fd   :  { %v460_v1 = vpop.xlane.xlu0 %459 }
 0x405   :  { %v472_v27 = vpop.xlane.xlu1 %471 }
 0x406   :  { %v469_v28 = vpop.xlane.xlu0 %468 }
 0x407   :  { %1113 = vrcp.f32 %v469_v28 }
 0x40d   :  { %v1114_v29 = vpop.eup %1113  ;;  %v466_v30 = vpop.xlane.xlu1 %465 }
 0x40e   :  { %v487_v31 = vmul.f32 %v1114_v29, %v1104_v9  ;;  %1115 = vrcp.f32 %v466_v30  ;;  %v1080_v9 = vld [vmem:[%s1561_s6] ss:$0 sm:$0xff] }
 0x40f   :  { %1117 = vrcp.f32 %v463_v63  ;;  %v826_v63 = vld [vmem:[%s1564_s9 + $0x10] sm:$0xff] }
 0x410   :  { %1039 = vmatmul.msk.f32.vlgmr.msrb.gmra.mxu1 %vm194_vm8, %v487_v31  ;;  %1119 = vrcp.f32 %v460_v1  ;;  %851 = vmatpush.msrb.mxu0 %v826_v63  ;;  %v825_v1 = vld [vmem:[%s1564_s9 + $0x8] sm:$0xff] }
 0x411   :  { %1121 = vrcp.f32 %v472_v27  ;;  %v824_v27 = vld [vmem:[%s1564_s9] sm:$0xff] }
 0x412   :  { %852 = vmatpush.msrb.mxu0 %v825_v1 }
 0x414   :  { %v1116_v32 = vpop.eup %1115  ;;  %853 = vmatpush.msrb.mxu0 %v824_v27 }
 0x415   :  { %v486_v33 = vmul.f32 %v1116_v32, %v1106_v13  ;;  %v1118_v34 = vpop.eup %1117 }
 0x416   :  { %v1120_v35 = vpop.eup %1119  ;;  %v485_v39 = vmul.f32 %v1118_v34, %v1413_v47 }
 0x417   :  { %1038 = vmatmul.msk.f32.vlgmr.msra.gmra.mxu0 %vm194_vm8, %v486_v33  ;;  %v484_v40 = vmul.f32 %v1120_v35, %v1419_v56  ;;  %v1122_v41 = vpop.eup %1121 }
 0x418   :  { %v488_v42 = vmul.f32 %v1122_v41, %v1423_v8 }
 0x419   :  { %v1069_v36 = vpop.permute.xlu0 %1068 }
 0x41a   :  { %v1071_v37 = vunpack.i.h.bf16 %v1069_v36  ;;  %v1070_v38 = vunpack.i.l.bf16 %v1069_v36 }
 0x41c   :  { %588 = vmatpush.msra.mxu2 %v1071_v37  ;;  %614 = vmatpush.msrb.mxu3 %v1070_v38  ;;  %v1081_v37 = vld [vmem:[%s1562_s7] ss:$0 sm:$0xff] }
 0x41d   :  { %1036 = vmatmul.msk.f32.vlgmr.msra.gmra.mxu2 %vm194_vm8, %v484_v40  ;;  %1037 = vmatmul.msk.f32.vlgmr.msrb.gmra.mxu3 %vm194_vm8, %v485_v39  ;;  %v512_v48 = vpop.f32.mrf.mxu3  ;;  %v1082_v40 = vld [vmem:[%s1563_s8] ss:$0 sm:$0xff] }
 0x41e   :  { %755 = vmatpush.msra.mxu3 %v732_v51 }
 0x420   :  { %756 = vmatpush.msra.mxu3 %v731_v53 }
 0x422   :  { %757 = vmatpush.msra.mxu3 %v730_v54 }
 0x424   :  { %758 = vmatpush.msra.mxu3 %v729_v55 }
 0x425   :  { %v672_v43 = vpop.permute.xlu1 %671 }
 0x426   :  { %692 = vmatpush.msrb.mxu2 %v672_v43 }
 0x427   :  { %1040 = vmatmul.msk.f32.vlgmr.msrb.gmra.mxu2 %vm194_vm8, %v488_v42 }
 0x451   :  { %v564_v44 = vpop.f32.mrf.mxu1 }
 0x452   :  { %699 = vrot.lane.b32.xlu0 %v564_v44, %s1211_s17 }
 0x453   :  { %v538_v45 = vpop.f32.mrf.mxu0 }
 0x48d   :  { %v668_v46 = vpop.f32.mrf.mxu1 }
 0x48e   :  { %715 = vrot.lane.b32.xlu0 %v668_v46, %s1219_s15 }
 0x494   :  { %v642_v47 = vpop.f32.mrf.mxu0 }
 0x496   :  { %709 = vrot.lane.b32.xlu0 %v642_v47, %s1220_s18 }
 0x4a0   :  { %v616_v49 = vpop.f32.mrf.mxu3  ;;  %v590_v50 = vpop.f32.mrf.mxu2 }
 0x4a1   :  { %707 = vrot.lane.b32.xlu2 %v616_v49, %s1220_s18 }
 0x4a9   :  { %701 = vrot.lane.b32.xlu2 %v590_v50, %s1211_s17 }
 0x4aa   :  { %v694_v52 = vpop.f32.mrf.mxu2 }
 0x4ab   :  { %717 = vrot.lane.b32.xlu1 %v694_v52, %s1219_s15 }
 0x4c4   :  { %v700_v56 = vpop.permute.xlu0 %699 }
 0x4c5   :  { %v721_v58 = vsel %vm194_vm8, %v512_v48, %v700_v56 }
 0x4fb   :  { %v708_v57 = vpop.permute.xlu2 %707 }
 0x4fc   :  { %v724_v60 = vsel %vm723_vm9, %v721_v58, %v708_v57 }
 0x500   :  { %v716_v61 = vpop.permute.xlu0 %715 }
 0x501   :  { %v727_v62 = vsel %vm726_vm10, %v724_v60, %v716_v61 }
 0x502   :  { %1041 = vmatmul.msk.f32.vlgmr.msra.gmra.mxu3 %vm79_vm0, %v727_v62  ;;  %v956_v62 = vld [vmem:[%s1566_s11 + $0x38] sm:$0xff] }
 0x503   :  { %v702_v3 = vpop.permute.xlu2 %701  ;;  %976 = vmatpush.msra.mxu1 %v956_v62 }
 0x504   :  { %v722_v5 = vsel %vm194_vm8, %v538_v45, %v702_v3 }
 0x508   :  { %v710_v4 = vpop.permute.xlu0 %709 }
 0x509   :  { %v725_v6 = vsel %vm723_vm9, %v722_v5, %v710_v4  ;;  %v955_v5 = vld [vmem:[%s1566_s11 + $0x30] sm:$0xff] }
 0x50a   :  { %977 = vmatpush.msra.mxu1 %v955_v5 }
 0x51d   :  { %v718_v7 = vpop.permute.xlu1 %717 }
 0x51e   :  { %v728_v8 = vsel %vm726_vm10, %v725_v6, %v718_v7 }
 0x51f   :  { %1042 = vmatmul.msk.f32.gmra.mxu3 %vm79_vm0, %v728_v8  ;;  %v954_v8 = vld [vmem:[%s1566_s11 + $0x28] sm:$0xff] }
 0x520   :  { %978 = vmatpush.msra.mxu1 %v954_v8 }
 0x585   :  { %v760_v11 = vpop.f32.mrf.mxu3 }
 0x586   :  { %v761_v12 = vadd.f32 %v1080_v9, %v760_v11 }
 0x588   :  { %v1468_v13 = vadd.f32 %v761_v12, %v1301_v0  ;;  %v953_v12 = vld [vmem:[%s1566_s11 + $0x20] sm:$0xff] }
 0x589   :  { %979 = vmatpush.msra.mxu1 %v953_v12 }
 0x58a   :  { %v770_v14 = vsel %vm79_vm0, %v1468_v13, 0.0 }
 0x58b   :  { %771 = vadd.xlane.f32.xlu2 %v770_v14 }
 0x5a2   :  { %v763_v15 = vpop.f32.mrf.mxu3 }
 0x5a3   :  { %v764_v16 = vadd.f32 %v1080_v9, %v763_v15 }
 0x5a5   :  { %v1473_v17 = vadd.f32 %v764_v16, %v1305_v2  ;;  %v952_v16 = vld [vmem:[%s1566_s11 + $0x18] sm:$0xff] }
 0x5a6   :  { %980 = vmatpush.msra.mxu1 %v952_v16 }
 0x5a7   :  { %v773_v18 = vsel %vm79_vm0, %v1473_v17, 0.0 }
 0x5a8   :  { %774 = vadd.xlane.f32.xlu0 %v773_v18 }
 0x5fe   :  { %v772_v19 = vpop.xlane.xlu2 %771 }
 0x5ff   :  { %v776_v20 = vmul.f32 %v772_v19, %v1309_v10  ;;  %v951_v19 = vld [vmem:[%s1566_s11 + $0x10] sm:$0xff] }
 0x600   :  { %981 = vmatpush.msra.mxu1 %v951_v19 }
 0x601   :  { %v778_v21 = vsub.f32 %v1468_v13, %v776_v20 }
 0x603   :  { %v780_v0 = vmul.f32 %v778_v21, %v778_v21 }
 0x605   :  { %v782_v22 = vsel %vm79_vm0, %v780_v0, 0.0  ;;  %v950_v0 = vld [vmem:[%s1566_s11 + $0x8] sm:$0xff] }
 0x606   :  { %783 = vadd.xlane.f32.xlu1 %v782_v22  ;;  %982 = vmatpush.msra.mxu1 %v950_v0 }
 0x61b   :  { %v775_v23 = vpop.xlane.xlu0 %774 }
 0x61c   :  { %v777_v24 = vmul.f32 %v775_v23, %v1309_v10  ;;  %v949_v23 = vld [vmem:[%s1566_s11] sm:$0xff] }
 0x61d   :  { %983 = vmatpush.msra.mxu1 %v949_v23 }
 0x61e   :  { %v779_v25 = vsub.f32 %v1473_v17, %v777_v24 }
 0x620   :  { %v781_v2 = vmul.f32 %v779_v25, %v779_v25 }
 0x622   :  { %v785_v26 = vsel %vm79_vm0, %v781_v2, 0.0 }
 0x623   :  { %786 = vadd.xlane.f32.xlu2 %v785_v26 }
 0x679   :  { %v784_v28 = vpop.xlane.xlu1 %783 }
 0x67a   :  { %v788_v29 = vmul.f32 %v784_v28, %v1309_v10 }
 0x67c   :  { %v790_v30 = vadd.f32 1e-05, %v788_v29 }
 0x67e   :  { %1123 = vrsqrt.f32 %v790_v30  ;;  %vm798_vm12 = vweird.f32 %v790_v30 }
 0x684   :  { %v1124_v31 = vpop.eup %1123 }
 0x685   :  { %v793_v32 = vmul.f32 %v1124_v31, %v790_v30  ;;  %vm799_vm11 = vweird.f32 %v1124_v31 }
 0x686   :  { %vm800_vm13 = vmor %vm798_vm12, %vm799_vm11 }
 0x687   :  { %v794_v33 = vmul.f32 %v1124_v31, %v793_v32 }
 0x689   :  { %v795_v34 = vmul.f32 0.5, %v794_v33 }
 0x68b   :  { %v796_v35 = vsub.f32 1.5, %v795_v34 }
 0x68d   :  { %v797_v36 = vmul.f32 %v1124_v31, %v796_v35 }
 0x68f   :  { %v801_v38 = vsel %vm800_vm13, %v1124_v31, %v797_v36 }
 0x690   :  { %v812_v39 = vmul.f32 %v801_v38, %v778_v21 }
 0x692   :  { %v817_v41 = vmul.f32 %v1081_v37, %v812_v39 }
 0x694   :  { %v822_v42 = vadd.f32 %v1082_v40, %v817_v41 }
 0x696   :  { %1043 = vmatmul.msk.f32.vlgmr.msrb.gmra.mxu0 %vm79_vm0, %v822_v42  ;;  %v787_v43 = vpop.xlane.xlu2 %786 }
 0x697   :  { %v789_v44 = vmul.f32 %v787_v43, %v1309_v10  ;;  %v1083_v10 = vld [vmem:[%s1565_s10] ss:$0 sm:$0xff] }
 0x699   :  { %v791_v45 = vadd.f32 1e-05, %v789_v44 }
 0x69b   :  { %1125 = vrsqrt.f32 %v791_v45  ;;  %vm808_vm15 = vweird.f32 %v791_v45 }
 0x6a1   :  { %v1126_v46 = vpop.eup %1125 }
 0x6a2   :  { %v803_v47 = vmul.f32 %v1126_v46, %v791_v45  ;;  %vm809_vm14 = vweird.f32 %v1126_v46 }
 0x6a3   :  { %vm810_vm1 = vmor %vm808_vm15, %vm809_vm14 }
 0x6a4   :  { %v804_v48 = vmul.f32 %v1126_v46, %v803_v47 }
 0x6a6   :  { %v805_v49 = vmul.f32 0.5, %v804_v48 }
 0x6a8   :  { %v806_v50 = vsub.f32 1.5, %v805_v49 }
 0x6aa   :  { %v807_v51 = vmul.f32 %v1126_v46, %v806_v50 }
 0x6ac   :  { %v811_v52 = vsel %vm810_vm1, %v1126_v46, %v807_v51 }
 0x6ad   :  { %v813_v53 = vmul.f32 %v811_v52, %v779_v25 }
 0x6af   :  { %v818_v54 = vmul.f32 %v1081_v37, %v813_v53 }
 0x6b1   :  { %v823_v55 = vadd.f32 %v1082_v40, %v818_v54 }
 0x6b3   :  { %1044 = vmatmul.msk.f32.gmra.mxu0 %vm79_vm0, %v823_v55 }
 0x713   :  { %v855_v56 = vpop.f32.mrf.mxu0 }
 0x714   :  { %v1508_v57 = vadd.f32 %v1083_v10, %v855_v56 }
 0x716   :  { %v863_v58 = vmul.f32 0.70710677, %v1508_v57  ;;  %v861_v56 = vmul.f32 0.5, %v1508_v57 }
 0x718   :  { %v865_v60 = vmul.f32 %v863_v58, %v863_v58 }
 0x71a   :  { %v866_v61 = vmin.f32 %v865_v60, 16.0 }
 0x71c   :  { %v867_v3 = vmul.f32 2.1237322e-06, %v866_v61  ;;  %v878_v4 = vmul.f32 3.8918573e-05, %v866_v61 }
 0x71e   :  { %v868_v6 = vadd.f32 0.00028619796, %v867_v3  ;;  %v879_v7 = vadd.f32 0.001143296, %v878_v4 }
 0x720   :  { %v869_v9 = vmul.f32 %v868_v6, %v866_v61  ;;  %v880_v11 = vmul.f32 %v879_v7, %v866_v61 }
 0x722   :  { %v870_v14 = vadd.f32 0.0036580483, %v869_v9  ;;  %v881_v15 = vadd.f32 0.014752088, %v880_v11 }
 0x724   :  { %v882_v18 = vmul.f32 %v881_v15, %v866_v61  ;;  %v871_v20 = vmul.f32 %v870_v14, %v866_v61 }
 0x726   :  { %v883_v21 = vadd.f32 0.112945676, %v882_v18  ;;  %v872_v24 = vadd.f32 0.05243302, %v871_v20 }
 0x728   :  { %v884_v22 = vmul.f32 %v883_v21, %v866_v61  ;;  %v873_v26 = vmul.f32 %v872_v24, %v866_v61 }
 0x72a   :  { %v885_v25 = vadd.f32 0.4994258, %v884_v22  ;;  %v874_v27 = vadd.f32 0.18741608, %v873_v26  ;;  %v1084_v26 = vld [vmem:[%s1567_s12] ss:$0 sm:$0xff] }
 0x72c   :  { %v886_v2 = vmul.f32 %v885_v25, %v866_v61  ;;  %v875_v31 = vmul.f32 %v874_v27, %v866_v61 }
 0x72e   :  { %v887_v59 = vadd.f32 1.0, %v886_v2  ;;  %v876_v37 = vadd.f32 1.1283791, %v875_v31 }
 0x730   :  { %1127 = vrcp.f32 %v887_v59  ;;  %v858_v63 = vpop.f32.mrf.mxu0  ;;  %v897_v38 = vand.u32 2147483647, %v887_v59  ;;  %v899_v39 = vand.u32 2147483648, %v887_v59  ;;  %vm893_vm3 = vweird.f32 %v887_v59 }
 0x731   :  { %v1535_v1 = vadd.f32 %v1083_v10, %v858_v63  ;;  %v877_v47 = vmul.f32 %v876_v37, %v863_v58 }
 0x732   :  { %v900_v46 = vor.u32 1.1754944e-38, %v899_v39  ;;  %vm898_vm5 = vcmp.eq.f32.partialorder %v897_v38, 8.507059e+37 }
 0x733   :  { %v864_v28 = vmul.f32 0.70710677, %v1535_v1  ;;  %v862_v24 = vmul.f32 0.5, %v1535_v1 }
 0x735   :  { %v905_v29 = vmul.f32 %v864_v28, %v864_v28 }
 0x736   :  { %v1128_v30 = vpop.eup %1127 }
 0x737   :  { %v889_v32 = vmul.f32 %v1128_v30, %v887_v59  ;;  %v906_v33 = vmin.f32 %v905_v29, 16.0  ;;  %vm894_vm2 = vweird.f32 %v1128_v30 }
 0x738   :  { %vm895_vm4 = vmor %vm893_vm3, %vm894_vm2 }
 0x739   :  { %v890_v34 = vsub.f32 1.0, %v889_v32  ;;  %v907_v35 = vmul.f32 2.1237322e-06, %v906_v33  ;;  %v918_v36 = vmul.f32 3.8918573e-05, %v906_v33 }
 0x73b   :  { %v891_v40 = vmul.f32 %v1128_v30, %v890_v34  ;;  %v908_v41 = vadd.f32 0.00028619796, %v907_v35  ;;  %v919_v42 = vadd.f32 0.001143296, %v918_v36 }
 0x73d   :  { %v892_v43 = vadd.f32 %v1128_v30, %v891_v40  ;;  %v909_v44 = vmul.f32 %v908_v41, %v906_v33  ;;  %v920_v45 = vmul.f32 %v919_v42, %v906_v33 }
 0x73f   :  { %v896_v48 = vsel %vm895_vm4, %v1128_v30, %v892_v43  ;;  %v921_v49 = vadd.f32 0.014752088, %v920_v45  ;;  %v910_v51 = vadd.f32 0.0036580483, %v909_v44 }
 0x740   :  { %v901_v50 = vsel %vm898_vm5, %v900_v46, %v896_v48 }
 0x741   :  { %v902_v52 = vmul.f32 %v901_v50, %v877_v47  ;;  %v922_v53 = vmul.f32 %v921_v49, %v906_v33  ;;  %v911_v10 = vmul.f32 %v910_v51, %v906_v33 }
 0x743   :  { %v1045_v54 = vclamps-f32 %v902_v52, 1.0  ;;  %v923_v55 = vadd.f32 0.112945676, %v922_v53  ;;  %v912_v4 = vadd.f32 0.05243302, %v911_v10 }
 0x745   :  { %v945_v60 = vadd.f32 1.0, %v1045_v54  ;;  %v924_v61 = vmul.f32 %v923_v55, %v906_v33  ;;  %v913_v6 = vmul.f32 %v912_v4, %v906_v33 }
 0x747   :  { %v947_v62 = vmul.f32 %v945_v60, %v861_v56  ;;  %v925_v3 = vadd.f32 0.4994258, %v924_v61  ;;  %v914_v7 = vadd.f32 0.18741608, %v913_v6 }
 0x749   :  { %v926_v5 = vmul.f32 %v925_v3, %v906_v33  ;;  %1047 = vmatmul.msk.f32.vlgmr.msra.gmra.mxu1 %vm961_vm6, %v947_v62  ;;  %v915_v9 = vmul.f32 %v914_v7, %v906_v33 }
 0x74b   :  { %v927_v58 = vadd.f32 1.0, %v926_v5  ;;  %v916_v15 = vadd.f32 1.1283791, %v915_v9 }
 0x74d   :  { %1129 = vrcp.f32 %v927_v58  ;;  %v939_v14 = vand.u32 2147483648, %v927_v58  ;;  %v937_v16 = vand.u32 2147483647, %v927_v58  ;;  %vm933_vm8 = vweird.f32 %v927_v58 }
 0x74e   :  { %v917_v20 = vmul.f32 %v916_v15, %v864_v28 }
 0x74f   :  { %v940_v19 = vor.u32 1.1754944e-38, %v939_v14  ;;  %vm938_vm10 = vcmp.eq.f32.partialorder %v937_v16, 8.507059e+37 }
 0x753   :  { %v1130_v8 = vpop.eup %1129 }
 0x754   :  { %v929_v11 = vmul.f32 %v1130_v8, %v927_v58  ;;  %vm934_vm7 = vweird.f32 %v1130_v8 }
 0x755   :  { %vm935_vm9 = vmor %vm933_vm8, %vm934_vm7 }
 0x756   :  { %v930_v12 = vsub.f32 1.0, %v929_v11 }
 0x758   :  { %v931_v57 = vmul.f32 %v1130_v8, %v930_v12 }
 0x75a   :  { %v932_v18 = vadd.f32 %v1130_v8, %v931_v57 }
 0x75c   :  { %v936_v21 = vsel %vm935_vm9, %v1130_v8, %v932_v18 }
 0x75d   :  { %v941_v0 = vsel %vm938_vm10, %v940_v19, %v936_v21 }
 0x75e   :  { %v942_v22 = vmul.f32 %v941_v0, %v917_v20 }
 0x760   :  { %v1046_v23 = vclamps-f32 %v942_v22, 1.0 }
 0x762   :  { %v946_v25 = vadd.f32 1.0, %v1046_v23 }
 0x764   :  { %v948_v2 = vmul.f32 %v946_v25, %v862_v24 }
 0x766   :  { %1048 = vmatmul.msk.f32.gmra.mxu1 %vm961_vm6, %v948_v2 }
 0x7c6   :  { %v985_v59 = vpop.f32.mrf.mxu1 }
 0x7c7   :  { %v986_v63 = vadd.f32 %v1084_v26, %v985_v59 }
 0x7c9   :  { %v991_v27 = vadd.f32 %v986_v63, %v1468_v13 }
 0x7cb   :  { %993 = vst.msk [vmem:[#allocation7] sm:$0xff] %vm79_vm0, %v991_v27 }
 0x7e3   :  { %v988_v28 = vpop.f32.mrf.mxu1 }
 0x7e4   :  { %v989_v1 = vadd.f32 %v1084_v26, %v988_v28 }
 0x7e6   :  { %v992_v29 = vadd.f32 %v989_v1, %v1473_v17 }
 0x7e8   :  { %994 = vst.msk [vmem:[#allocation7 + $0x8] sm:$0xff] %vm79_vm0, %v992_v29 }
 0x7e9   :  { %1007 = dma.vmem_to_hbm [thread:$0]  %s1000_s29, 256, %s1002_s14, [#allocation4], %s1210_s16, %s1210_s16, %s1211_s17  }
 0x7ea   :  { %1207 = dma.done.wait [#allocation4], 256  }
 0x7eb   :  { %1208 = vsyncadd [#allocation4], 4294967040 }
 0x7ec   :  { %1012 = vsyncpa [#allocation3], 1 }
 0x7ed   :  { %1013 = vsyncpa [#allocation6], 1 }
 0x7ee   :  { %1014 = vsyncpa [#allocation4], 1 }

</bundles_post_ra>
